<compile_context>
chip_gen: v5e
topology: v5e:2x2
jax: 0.10.0
libtpu: 0.0.40
codegen_flags: <defaults>
</compile_context>

<pallas_src>
import functools

import jax
import jax.numpy as jnp
from jax.experimental import pallas as pl
from jax.experimental.pallas import tpu as pltpu


def _round_up(a: int, m: int) -> int:
    return ((a + m - 1) // m) * m


# ---------------------------------------------------------------------------
# Pass 1: pointwise_conv1 + GLU + depthwise conv + BN partial statistics
# ---------------------------------------------------------------------------
def _pw_glu_dw_stats_kernel(x_ref, *refs, kernel_size: int, halo: int,
                            matmul_dtype, has_halo: bool):
    """refs = ([xl, xr,] w1a, b1a, w1g, b1g, wdw, bdw, u, sum, ssq)."""
    K = kernel_size
    pad = (K - 1) // 2
    tile_t, d = x_ref.shape[1], x_ref.shape[2]

    if has_halo:
        (xl_ref, xr_ref, w1a_ref, b1a_ref, w1g_ref, b1g_ref,
         wdw_ref, bdw_ref, u_ref, sum_ref, ssq_ref) = refs
    else:
        (w1a_ref, b1a_ref, w1g_ref, b1g_ref,
         wdw_ref, bdw_ref, u_ref, sum_ref, ssq_ref) = refs

    t = pl.program_id(1)
    nt = pl.num_programs(1)

    # --- pointwise_conv1 + GLU, once, on the halo-concatenated slab ----------
    if has_halo:
        x_full = jnp.concatenate([xl_ref[0], x_ref[0], xr_ref[0]], axis=0)
    else:
        x_full = x_ref[0]                                # (tile_t, D)

    xc = x_full.astype(matmul_dtype)                     # weights are pre-cast
    a = jnp.dot(xc, w1a_ref[...], preferred_element_type=jnp.float32) + b1a_ref[...]
    g = jnp.dot(xc, w1g_ref[...], preferred_element_type=jnp.float32) + b1g_ref[...]
    u_full = a * jax.nn.sigmoid(g)                       # GLU, f32

    # --- boundary 'same' zero padding as a row mask on first/last tile -------
    if has_halo:
        n_rows = tile_t + 2 * halo
        rows = jax.lax.broadcasted_iota(jnp.int32, (n_rows, 1), 0)
        keep_l = jnp.logical_or(t > 0, rows >= halo)
        keep_r = jnp.logical_or(t < nt - 1, rows < halo + tile_t)
        u_full = u_full * jnp.logical_and(keep_l, keep_r).astype(jnp.float32)
        start = halo - pad
    else:
        start = 0

    # --- depthwise conv over T (groups == channels): K static shifted MACs ---
    wdw = wdw_ref[...]                                   # (K, D) f32
    acc = u_full[start:start + tile_t, :] * wdw[0][None, :]
    for k in range(1, K):
        acc = acc + u_full[start + k:start + k + tile_t, :] * wdw[k][None, :]
    acc = acc + bdw_ref[...]                             # (1, D) broadcast add

    u_ref[0] = acc.astype(u_ref.dtype)                   # bf16 intermediate by default

    # --- BatchNorm batch statistics: per-tile partials (reduced in JAX glue) -
    sum_ref[...] = jnp.sum(acc, axis=0, keepdims=True).reshape(1, 1, 1, d)
    ssq_ref[...] = jnp.sum(acc * acc, axis=0, keepdims=True).reshape(1, 1, 1, d)


# ---------------------------------------------------------------------------
# Pass 2: BatchNorm (folded to scale/shift) + ReLU + pointwise_conv2
# ---------------------------------------------------------------------------
def _bn_act_pw2_kernel(u_ref, scale_ref, shift_ref, w2_ref, b2_ref, o_ref,
                       *, matmul_dtype):
    u = u_ref[0].astype(jnp.float32)                                 # (TILE_T, D)
    y = jnp.maximum(u * scale_ref[...] + shift_ref[...], 0.0)        # BN affine + ReLU (f32)
    out = jnp.dot(y.astype(matmul_dtype), w2_ref[...],               # w2 pre-cast
                  preferred_element_type=jnp.float32) + b2_ref[...]
    o_ref[0] = out.astype(o_ref.dtype)


def conformer_convolution(x, params, *, kernel_size: int, eps: float = 1e-5,
                          tile_t: int | None = None,
                          matmul_dtype=jnp.bfloat16):
    """x: (B, T, D) float32. Returns (y, cache) with cache passthrough (None)."""
    B, T, D = x.shape
    K = kernel_size
    assert (K - 1) % 2 == 0, "kernel_size must be odd"
    pad = (K - 1) // 2
    has_halo = pad > 0
    halo = _round_up(max(pad, 1), 8)          # halo block rows (sublane multiple)

    if tile_t is None:
        tile_t = T if T <= 512 else 512
    assert tile_t % 8 == 0 and tile_t % halo == 0, "tile_t must be a multiple of 8 and of halo"
    assert T % tile_t == 0, "T must be a multiple of tile_t"
    nt = T // tile_t
    c = tile_t // halo
    n_halo_blocks = T // halo

    f32 = jnp.float32
    _w_idx = lambda b, t: (0, 0)              # small weight blocks: constant index, resident

    # Pre-cast matmul weights once in the wrapper (no per-step casts in-kernel,
    # halves resident weight VMEM).  Biases / depthwise weights stay f32.
    w1a_c = params["w1a"].astype(matmul_dtype)
    w1g_c = params["w1g"].astype(matmul_dtype)
    w2_c = params["w2"].astype(matmul_dtype)

    # ---------------- pass 1 --------------------------------------------------
    kernel1 = functools.partial(_pw_glu_dw_stats_kernel,
                                kernel_size=K, halo=halo,
                                matmul_dtype=matmul_dtype, has_halo=has_halo)
    rows_per_tile = tile_t + (2 * halo if has_halo else 0)
    flops1 = int(4 * B * nt * rows_per_tile * D * D + B * T * D * (2 * K + 8))
    bytes1 = int(4 * B * T * D + jnp.dtype(matmul_dtype).itemsize * (B * T * D + 2 * D * D)
                 + 4 * (2 * B * nt * D + (K + 4) * D))

    x_spec = pl.BlockSpec((1, tile_t, D), lambda b, t: (b, t, 0))
    in_specs = [x_spec]
    args = [x]
    if has_halo:
        in_specs += [
            pl.BlockSpec((1, halo, D), lambda b, t: (b, jnp.maximum(t * c - 1, 0), 0)),
            pl.BlockSpec((1, halo, D),
                         lambda b, t: (b, jnp.minimum((t + 1) * c, n_halo_blocks - 1), 0)),
        ]
        args += [x, x]
    in_specs += [
        pl.BlockSpec((D, D), _w_idx),     # w1a (pre-cast)
        pl.BlockSpec((1, D), _w_idx),     # b1a
        pl.BlockSpec((D, D), _w_idx),     # w1g (pre-cast)
        pl.BlockSpec((1, D), _w_idx),     # b1g
        pl.BlockSpec((K, D), _w_idx),     # wdw
        pl.BlockSpec((1, D), _w_idx),     # bdw
    ]
    args += [w1a_c, params["b1a"], w1g_c, params["b1g"], params["wdw"], params["bdw"]]

    u, sums, ssqs = pl.pallas_call(
        kernel1,
        grid=(B, nt),
        in_specs=in_specs,
        out_specs=(
            pl.BlockSpec((1, tile_t, D), lambda b, t: (b, t, 0)),
            pl.BlockSpec((1, 1, 1, D), lambda b, t: (b, t, 0, 0)),
            pl.BlockSpec((1, 1, 1, D), lambda b, t: (b, t, 0, 0)),
        ),
        out_shape=(
            jax.ShapeDtypeStruct((B, T, D), matmul_dtype),  # pre-norm depthwise output
            jax.ShapeDtypeStruct((B, nt, 1, D), f32),       # per-tile channel sum
            jax.ShapeDtypeStruct((B, nt, 1, D), f32),       # per-tile channel sum of squares
        ),
        compiler_params=pltpu.CompilerParams(
            # No cross-tile state -> both axes parallel (uses both v7x TCs even
            # for odd/small B).  32 MiB stays within half of v7x's 64 MiB VMEM.
            dimension_semantics=("parallel", "parallel"),
            vmem_limit_bytes=32 * 1024 * 1024),
        cost_estimate=pl.CostEstimate(flops=flops1,
                                      transcendentals=int(B * nt * rows_per_tile * D),
                                      bytes_accessed=bytes1),
    )(*args)

    # -------- BatchNorm1d (training-mode batch stats) folded to scale/shift ---
    n = B * T
    mean = jnp.sum(sums, axis=(0, 1, 2)) / n                                  # (D,)
    var = jnp.maximum(jnp.sum(ssqs, axis=(0, 1, 2)) / n - mean * mean, 0.0)   # biased
    inv = jax.lax.rsqrt(var + eps)
    gamma = params["gamma"].reshape(-1)
    beta = params["beta"].reshape(-1)
    scale = (gamma * inv).reshape(1, D).astype(f32)
    shift = (beta - gamma * inv * mean).reshape(1, D).astype(f32)

    # ---------------- pass 2 --------------------------------------------------
    kernel2 = functools.partial(_bn_act_pw2_kernel, matmul_dtype=matmul_dtype)
    flops2 = int(2 * B * T * D * D + 4 * B * T * D)
    bytes2 = int(jnp.dtype(matmul_dtype).itemsize * (B * T * D + D * D)
                 + 4 * (B * T * D + 3 * D))

    y = pl.pallas_call(
        kernel2,
        grid=(B, nt),
        in_specs=[
            pl.BlockSpec((1, tile_t, D), lambda b, t: (b, t, 0)),   # u
            pl.BlockSpec((1, D), _w_idx),                           # scale
            pl.BlockSpec((1, D), _w_idx),                           # shift
            pl.BlockSpec((D, D), _w_idx),                           # w2 (pre-cast)
            pl.BlockSpec((1, D), _w_idx),                           # b2
        ],
        out_specs=pl.BlockSpec((1, tile_t, D), lambda b, t: (b, t, 0)),
        out_shape=jax.ShapeDtypeStruct((B, T, D), x.dtype),
        compiler_params=pltpu.CompilerParams(
            dimension_semantics=("parallel", "parallel"),
            vmem_limit_bytes=32 * 1024 * 1024),
        cost_estimate=pl.CostEstimate(flops=flops2, transcendentals=0,
                                      bytes_accessed=bytes2),
    )(u, scale, shift, w2_c, params["b2"])

    return y, None   # TODO(synk): causal / streaming cache path (lorder > 0)


def _reference(x, params, kernel_size, eps=1e-5):
    """Pure-JAX reference mirroring the PyTorch forward (non-causal, train-mode BN)."""
    B, T, D = x.shape
    K = kernel_size
    pad = (K - 1) // 2
    x2 = x.reshape(B * T, D)
    a = x2 @ params["w1a"] + params["b1a"]
    g = x2 @ params["w1g"] + params["b1g"]
    xg = (a * jax.nn.sigmoid(g)).reshape(B, T, D)
    xp = jnp.pad(xg, ((0, 0), (pad, pad), (0, 0)))
    acc = jnp.zeros((B, T, D), jnp.float32)
    for k in range(K):
        acc = acc + xp[:, k:k + T, :] * params["wdw"][k][None, None, :]
    acc = acc + params["bdw"].reshape(1, 1, D)
    mean = jnp.mean(acc, axis=(0, 1), keepdims=True)
    var = jnp.mean((acc - mean) ** 2, axis=(0, 1), keepdims=True)
    xn = (acc - mean) / jnp.sqrt(var + eps)
    xn = xn * params["gamma"].reshape(1, 1, D) + params["beta"].reshape(1, 1, D)
    xr = jnp.maximum(xn, 0.0)
    out = xr.reshape(B * T, D) @ params["w2"] + params["b2"]
    return out.reshape(B, T, D)


if __name__ == "__main__":
    # Small deterministic configuration (lane-dense D=128, several T tiles).
    B, T, D = 2, 64, 128     # batch, time, channels (D_hidden)
    K = 3                    # depthwise conv kernel size (odd)
    TILE_T = 16              # small tile so the halo/masking path is exercised

    key = jax.random.PRNGKey(0)
    keys = jax.random.split(key, 8)

    # Parameters stored pre-transposed for channels-last matmuls:
    #   w1a / w1g = pointwise_conv1.weight[:, :, 0].T split into GLU halves (D, D)
    #   wdw       = depthwise_conv.weight[:, 0, :].T                        (K, D)
    #   w2        = pointwise_conv2.weight[:, :, 0].T                       (D, D)
    w1 = jax.random.normal(keys[0], (D, 2 * D), jnp.float32) * 0.1
    b1 = jax.random.normal(keys[1], (1, 2 * D), jnp.float32) * 0.1
    params = {
        "w1a": w1[:, :D], "b1a": b1[:, :D],
        "w1g": w1[:, D:], "b1g": b1[:, D:],
        "wdw": jax.random.normal(keys[2], (K, D), jnp.float32) * 0.1,
        "bdw": jax.random.normal(keys[3], (1, D), jnp.float32) * 0.1,
        "gamma": jnp.ones((1, D), jnp.float32),    # BatchNorm1d default weight
        "beta": jnp.zeros((1, D), jnp.float32),    # BatchNorm1d default bias
        "w2": jax.random.normal(keys[4], (D, D), jnp.float32) * 0.1,
        "b2": jax.random.normal(keys[5], (1, D), jnp.float32) * 0.1,
    }
    x = jax.random.normal(keys[6], (B, T, D), jnp.float32)

    y_ref = _reference(x, params, K)

    # Exact path (f32 matmuls, f32 intermediate) — tight tolerance.
    y32, cache = conformer_convolution(x, params, kernel_size=K, tile_t=TILE_T,
                                       matmul_dtype=jnp.float32)
    y32 = jax.block_until_ready(y32)
    assert y32.shape == (B, T, D)
    assert cache is None
    err32 = float(jnp.max(jnp.abs(y32 - y_ref)))
    assert jnp.allclose(y32, y_ref, atol=5e-4, rtol=5e-4), f"f32 mismatch: {err32}"

    # Default fast path (bf16 matmuls + bf16 intermediate u) — loose tolerance.
    ybf, _ = conformer_convolution(x, params, kernel_size=K, tile_t=TILE_T)
    ybf = jax.block_until_ready(ybf)
    errbf = float(jnp.max(jnp.abs(ybf - y_ref)))
    assert jnp.allclose(ybf, y_ref, atol=1e-1, rtol=1e-1), f"bf16 mismatch: {errbf}"

    print("KERNEL_OK")
</pallas_src>

<mosaic_0001>
module attributes {stable_mosaic.version = 11 : i64} {
  func.func @_pw_glu_dw_stats_kernel(%arg0: i32, %arg1: i32, %arg2: memref<1x16x128xf32, #tpu.memory_space<vmem>>, %arg3: memref<1x8x128xf32, #tpu.memory_space<vmem>>, %arg4: memref<1x8x128xf32, #tpu.memory_space<vmem>>, %arg5: memref<128x128xf32, #tpu.memory_space<vmem>>, %arg6: memref<1x128xf32, #tpu.memory_space<vmem>>, %arg7: memref<128x128xf32, #tpu.memory_space<vmem>>, %arg8: memref<1x128xf32, #tpu.memory_space<vmem>>, %arg9: memref<3x128xf32, #tpu.memory_space<vmem>>, %arg10: memref<1x128xf32, #tpu.memory_space<vmem>>, %arg11: memref<1x16x128xf32, #tpu.memory_space<vmem>>, %arg12: memref<1x1x1x128xf32, #tpu.memory_space<vmem>>, %arg13: memref<1x1x1x128xf32, #tpu.memory_space<vmem>>) attributes {dimension_semantics = [#tpu.dimension_semantics<parallel>, #tpu.dimension_semantics<parallel>], iteration_bounds = array<i64: 2, 4>, scalar_prefetch = 0 : i64, scratch_operands = 0 : i64, tpu.core_type = #tpu.core_type<tc>, window_params = [{transform_indices = @transform_0, window_bounds = array<i64: 1, 16, 128>}, {transform_indices = @transform_1, window_bounds = array<i64: 1, 8, 128>}, {transform_indices = @transform_2, window_bounds = array<i64: 1, 8, 128>}, {pipeline_mode = #tpu.pipeline_mode<synchronous>, transform_indices = @transform_3, window_bounds = array<i64: 128, 128>}, {pipeline_mode = #tpu.pipeline_mode<synchronous>, transform_indices = @transform_4, window_bounds = array<i64: 1, 128>}, {pipeline_mode = #tpu.pipeline_mode<synchronous>, transform_indices = @transform_5, window_bounds = array<i64: 128, 128>}, {pipeline_mode = #tpu.pipeline_mode<synchronous>, transform_indices = @transform_6, window_bounds = array<i64: 1, 128>}, {pipeline_mode = #tpu.pipeline_mode<synchronous>, transform_indices = @transform_7, window_bounds = array<i64: 3, 128>}, {pipeline_mode = #tpu.pipeline_mode<synchronous>, transform_indices = @transform_8, window_bounds = array<i64: 1, 128>}, {transform_indices = @transform_9, window_bounds = array<i64: 1, 16, 128>}, {transform_indices = @transform_10, window_bounds = array<i64: 1, 1, 1, 128>}, {transform_indices = @transform_11, window_bounds = array<i64: 1, 1, 1, 128>}]} {
    %c0 = arith.constant 0 : index
    %c0_0 = arith.constant 0 : index
    %c0_1 = arith.constant 0 : index
    %0 = vector.load %arg3[%c0, %c0_0, %c0_1] : memref<1x8x128xf32, #tpu.memory_space<vmem>>, vector<1x8x128xf32>
    %1 = vector.shape_cast %0 : vector<1x8x128xf32> to vector<8x128xf32>
    %c0_2 = arith.constant 0 : index
    %c0_3 = arith.constant 0 : index
    %c0_4 = arith.constant 0 : index
    %2 = vector.load %arg2[%c0_2, %c0_3, %c0_4] : memref<1x16x128xf32, #tpu.memory_space<vmem>>, vector<1x16x128xf32>
    %3 = vector.shape_cast %2 : vector<1x16x128xf32> to vector<16x128xf32>
    %c0_5 = arith.constant 0 : index
    %c0_6 = arith.constant 0 : index
    %c0_7 = arith.constant 0 : index
    %4 = vector.load %arg4[%c0_5, %c0_6, %c0_7] : memref<1x8x128xf32, #tpu.memory_space<vmem>>, vector<1x8x128xf32>
    %5 = vector.shape_cast %4 : vector<1x8x128xf32> to vector<8x128xf32>
    %6 = tpu.concatenate %1, %3, %5 in 0 : vector<8x128xf32>, vector<16x128xf32>, vector<8x128xf32> -> vector<32x128xf32>
    %c0_8 = arith.constant 0 : index
    %c0_9 = arith.constant 0 : index
    %7 = vector.load %arg5[%c0_8, %c0_9] : memref<128x128xf32, #tpu.memory_space<vmem>>, vector<128x128xf32>
    %cst = arith.constant dense<0.000000e+00> : vector<32x128xf32>
    %8 = tpu.matmul %6, %7, %cst {dimension_numbers = #tpu.dot_dimension_numbers<[1], [0], [0], [1], [0, 0, 1, 1], [], []>} : vector<32x128xf32>, vector<128x128xf32>, vector<32x128xf32> -> vector<32x128xf32>
    %c0_10 = arith.constant 0 : index
    %c0_11 = arith.constant 0 : index
    %9 = vector.load %arg6[%c0_10, %c0_11] : memref<1x128xf32, #tpu.memory_space<vmem>>, vector<1x128xf32>
    %10 = vector.broadcast %9 : vector<1x128xf32> to vector<32x128xf32>
    %11 = arith.addf %8, %10 : vector<32x128xf32>
    %c0_12 = arith.constant 0 : index
    %c0_13 = arith.constant 0 : index
    %12 = vector.load %arg7[%c0_12, %c0_13] : memref<128x128xf32, #tpu.memory_space<vmem>>, vector<128x128xf32>
    %cst_14 = arith.constant dense<0.000000e+00> : vector<32x128xf32>
    %13 = tpu.matmul %6, %12, %cst_14 {dimension_numbers = #tpu.dot_dimension_numbers<[1], [0], [0], [1], [0, 0, 1, 1], [], []>} : vector<32x128xf32>, vector<128x128xf32>, vector<32x128xf32> -> vector<32x128xf32>
    %c0_15 = arith.constant 0 : index
    %c0_16 = arith.constant 0 : index
    %14 = vector.load %arg8[%c0_15, %c0_16] : memref<1x128xf32, #tpu.memory_space<vmem>>, vector<1x128xf32>
    %15 = vector.broadcast %14 : vector<1x128xf32> to vector<32x128xf32>
    %16 = arith.addf %13, %15 : vector<32x128xf32>
    %17 = arith.negf %16 : vector<32x128xf32>
    %18 = math.exp %17 : vector<32x128xf32>
    %cst_17 = arith.constant 1.000000e+00 : f32
    %19 = vector.broadcast %cst_17 : f32 to vector<32x128xf32>
    %20 = arith.addf %19, %18 : vector<32x128xf32>
    %21 = arith.divf %19, %20 : vector<32x128xf32>
    %22 = arith.mulf %11, %21 : vector<32x128xf32>
    %23 = tpu.iota {dimensions = array<i32: 0>} : vector<32x1xi32>
    %c0_i32 = arith.constant 0 : i32
    %24 = arith.cmpi sgt, %arg1, %c0_i32 : i32
    %c8_i32 = arith.constant 8 : i32
    %25 = vector.broadcast %c8_i32 : i32 to vector<32x1xi32>
    %26 = arith.cmpi sge, %23, %25 : vector<32x1xi32>
    %27 = vector.broadcast %24 : i1 to vector<32x1xi1>
    %28 = arith.ori %27, %26 : vector<32x1xi1>
    %c3_i32 = arith.constant 3 : i32
    %29 = arith.cmpi slt, %arg1, %c3_i32 : i32
    %c24_i32 = arith.constant 24 : i32
    %30 = vector.broadcast %c24_i32 : i32 to vector<32x1xi32>
    %31 = arith.cmpi slt, %23, %30 : vector<32x1xi32>
    %32 = vector.broadcast %29 : i1 to vector<32x1xi1>
    %33 = arith.ori %32, %31 : vector<32x1xi1>
    %34 = arith.andi %28, %33 : vector<32x1xi1>
    %35 = arith.extui %34 : vector<32x1xi1> to vector<32x1xi32>
    %36 = arith.sitofp %35 : vector<32x1xi32> to vector<32x1xf32>
    %37 = vector.broadcast %36 : vector<32x1xf32> to vector<32x128xf32>
    %38 = arith.mulf %22, %37 : vector<32x128xf32>
    %c0_18 = arith.constant 0 : index
    %c0_19 = arith.constant 0 : index
    %39 = vector.load %arg9[%c0_18, %c0_19] : memref<3x128xf32, #tpu.memory_space<vmem>>, vector<3x128xf32>
    %40 = vector.extract_strided_slice %38 {offsets = [7, 0], sizes = [16, 128], strides = [1, 1]} : vector<32x128xf32> to vector<16x128xf32>
    %41 = vector.extract_strided_slice %39 {offsets = [0, 0], sizes = [1, 128], strides = [1, 1]} : vector<3x128xf32> to vector<1x128xf32>
    %42 = vector.shape_cast %41 : vector<1x128xf32> to vector<128xf32>
    %43 = vector.shape_cast %42 : vector<128xf32> to vector<1x128xf32>
    %44 = vector.broadcast %43 : vector<1x128xf32> to vector<16x128xf32>
    %45 = arith.mulf %40, %44 : vector<16x128xf32>
    %46 = vector.extract_strided_slice %38 {offsets = [8, 0], sizes = [16, 128], strides = [1, 1]} : vector<32x128xf32> to vector<16x128xf32>
    %47 = vector.extract_strided_slice %39 {offsets = [1, 0], sizes = [1, 128], strides = [1, 1]} : vector<3x128xf32> to vector<1x128xf32>
    %48 = vector.shape_cast %47 : vector<1x128xf32> to vector<128xf32>
    %49 = vector.shape_cast %48 : vector<128xf32> to vector<1x128xf32>
    %50 = vector.broadcast %49 : vector<1x128xf32> to vector<16x128xf32>
    %51 = arith.mulf %46, %50 : vector<16x128xf32>
    %52 = arith.addf %45, %51 : vector<16x128xf32>
    %53 = vector.extract_strided_slice %38 {offsets = [9, 0], sizes = [16, 128], strides = [1, 1]} : vector<32x128xf32> to vector<16x128xf32>
    %54 = vector.extract_strided_slice %39 {offsets = [2, 0], sizes = [1, 128], strides = [1, 1]} : vector<3x128xf32> to vector<1x128xf32>
    %55 = vector.shape_cast %54 : vector<1x128xf32> to vector<128xf32>
    %56 = vector.shape_cast %55 : vector<128xf32> to vector<1x128xf32>
    %57 = vector.broadcast %56 : vector<1x128xf32> to vector<16x128xf32>
    %58 = arith.mulf %53, %57 : vector<16x128xf32>
    %59 = arith.addf %52, %58 : vector<16x128xf32>
    %c0_20 = arith.constant 0 : index
    %c0_21 = arith.constant 0 : index
    %60 = vector.load %arg10[%c0_20, %c0_21] : memref<1x128xf32, #tpu.memory_space<vmem>>, vector<1x128xf32>
    %61 = vector.broadcast %60 : vector<1x128xf32> to vector<16x128xf32>
    %62 = arith.addf %59, %61 : vector<16x128xf32>
    %c0_22 = arith.constant 0 : index
    %c0_23 = arith.constant 0 : index
    %c0_24 = arith.constant 0 : index
    %63 = vector.load %arg11[%c0_22, %c0_23, %c0_24] : memref<1x16x128xf32, #tpu.memory_space<vmem>>, vector<1x16x128xf32>
    %64 = vector.shape_cast %63 : vector<1x16x128xf32> to vector<16x128xf32>
    %65 = vector.shape_cast %62 : vector<16x128xf32> to vector<1x16x128xf32>
    tpu.vector_store %arg11[%c0_22, %c0_23, %c0_24], %65 {strides = array<i32>} : memref<1x16x128xf32, #tpu.memory_space<vmem>>, vector<1x16x128xf32>,
    %cst_25 = arith.constant dense<0.000000e+00> : vector<128xf32>
    %66 = vector.multi_reduction <add>, %62, %cst_25 [0] : vector<16x128xf32> to vector<128xf32>
    %67 = vector.shape_cast %66 : vector<128xf32> to vector<1x128xf32>
    %68 = vector.shape_cast %67 : vector<1x128xf32> to vector<1x1x1x128xf32>
    %c0_26 = arith.constant 0 : index
    %c0_27 = arith.constant 0 : index
    %c0_28 = arith.constant 0 : index
    %c0_29 = arith.constant 0 : index
    %69 = vector.load %arg12[%c0_26, %c0_27, %c0_28, %c0_29] : memref<1x1x1x128xf32, #tpu.memory_space<vmem>>, vector<1x1x1x128xf32>
    tpu.vector_store %arg12[%c0_26, %c0_27, %c0_28, %c0_29], %68 {strides = array<i32>} : memref<1x1x1x128xf32, #tpu.memory_space<vmem>>, vector<1x1x1x128xf32>,
    %70 = arith.mulf %62, %62 : vector<16x128xf32>
    %cst_30 = arith.constant dense<0.000000e+00> : vector<128xf32>
    %71 = vector.multi_reduction <add>, %70, %cst_30 [0] : vector<16x128xf32> to vector<128xf32>
    %72 = vector.shape_cast %71 : vector<128xf32> to vector<1x128xf32>
    %73 = vector.shape_cast %72 : vector<1x128xf32> to vector<1x1x1x128xf32>
    %c0_31 = arith.constant 0 : index
    %c0_32 = arith.constant 0 : index
    %c0_33 = arith.constant 0 : index
    %c0_34 = arith.constant 0 : index
    %74 = vector.load %arg13[%c0_31, %c0_32, %c0_33, %c0_34] : memref<1x1x1x128xf32, #tpu.memory_space<vmem>>, vector<1x1x1x128xf32>
    tpu.vector_store %arg13[%c0_31, %c0_32, %c0_33, %c0_34], %73 {strides = array<i32>} : memref<1x1x1x128xf32, #tpu.memory_space<vmem>>, vector<1x1x1x128xf32>,
    return
  }
  func.func @transform_0(%arg0: i32, %arg1: i32) -> (i32, i32, i32) {
    %c0_i32 = arith.constant 0 : i32
    %c0_i32_0 = arith.constant 0 : i32
    return %arg0, %arg1, %c0_i32 : i32, i32, i32
  }
  func.func @transform_1(%arg0: i32, %arg1: i32) -> (i32, i32, i32) {
    %c2_i32 = arith.constant 2 : i32
    %0 = arith.muli %arg1, %c2_i32 : i32
    %c1_i32 = arith.constant 1 : i32
    %1 = arith.subi %0, %c1_i32 : i32
    %c0_i32 = arith.constant 0 : i32
    %2 = arith.maxsi %1, %c0_i32 : i32
    %c0_i32_0 = arith.constant 0 : i32
    %c0_i32_1 = arith.constant 0 : i32
    return %arg0, %2, %c0_i32_0 : i32, i32, i32
  }
  func.func @transform_2(%arg0: i32, %arg1: i32) -> (i32, i32, i32) {
    %c1_i32 = arith.constant 1 : i32
    %0 = arith.addi %arg1, %c1_i32 : i32
    %c2_i32 = arith.constant 2 : i32
    %1 = arith.muli %0, %c2_i32 : i32
    %c7_i32 = arith.constant 7 : i32
    %2 = arith.minsi %1, %c7_i32 : i32
    %c0_i32 = arith.constant 0 : i32
    %c0_i32_0 = arith.constant 0 : i32
    return %arg0, %2, %c0_i32 : i32, i32, i32
  }
  func.func @transform_3(%arg0: i32, %arg1: i32) -> (i32, i32) {
    %c0_i32 = arith.constant 0 : i32
    %c0_i32_0 = arith.constant 0 : i32
    %c0_i32_1 = arith.constant 0 : i32
    return %c0_i32, %c0_i32_0 : i32, i32
  }
  func.func @transform_4(%arg0: i32, %arg1: i32) -> (i32, i32) {
    %c0_i32 = arith.constant 0 : i32
    %c0_i32_0 = arith.constant 0 : i32
    %c0_i32_1 = arith.constant 0 : i32
    return %c0_i32, %c0_i32_0 : i32, i32
  }
  func.func @transform_5(%arg0: i32, %arg1: i32) -> (i32, i32) {
    %c0_i32 = arith.constant 0 : i32
    %c0_i32_0 = arith.constant 0 : i32
    %c0_i32_1 = arith.constant 0 : i32
    return %c0_i32, %c0_i32_0 : i32, i32
  }
  func.func @transform_6(%arg0: i32, %arg1: i32) -> (i32, i32) {
    %c0_i32 = arith.constant 0 : i32
    %c0_i32_0 = arith.constant 0 : i32
    %c0_i32_1 = arith.constant 0 : i32
    return %c0_i32, %c0_i32_0 : i32, i32
  }
  func.func @transform_7(%arg0: i32, %arg1: i32) -> (i32, i32) {
    %c0_i32 = arith.constant 0 : i32
    %c0_i32_0 = arith.constant 0 : i32
    %c0_i32_1 = arith.constant 0 : i32
    return %c0_i32, %c0_i32_0 : i32, i32
  }
  func.func @transform_8(%arg0: i32, %arg1: i32) -> (i32, i32) {
    %c0_i32 = arith.constant 0 : i32
    %c0_i32_0 = arith.constant 0 : i32
    %c0_i32_1 = arith.constant 0 : i32
    return %c0_i32, %c0_i32_0 : i32, i32
  }
  func.func @transform_9(%arg0: i32, %arg1: i32) -> (i32, i32, i32) {
    %c0_i32 = arith.constant 0 : i32
    %c0_i32_0 = arith.constant 0 : i32
    return %arg0, %arg1, %c0_i32 : i32, i32, i32
  }
  func.func @transform_10(%arg0: i32, %arg1: i32) -> (i32, i32, i32, i32) {
    %c0_i32 = arith.constant 0 : i32
    %c0_i32_0 = arith.constant 0 : i32
    %c0_i32_1 = arith.constant 0 : i32
    return %arg0, %arg1, %c0_i32, %c0_i32_0 : i32, i32, i32, i32
  }
  func.func @transform_11(%arg0: i32, %arg1: i32) -> (i32, i32, i32, i32) {
    %c0_i32 = arith.constant 0 : i32
    %c0_i32_0 = arith.constant 0 : i32
    %c0_i32_1 = arith.constant 0 : i32
    return %arg0, %arg1, %c0_i32, %c0_i32_0 : i32, i32, i32, i32
  }
}

</mosaic_0001>

<bundles_post_ra>
// kernel: tpu_custom_call.1
= control target key start
LH: loop header
LB: loop body
LE: loop exit
PB: predicated region body
PF: predicated region fallthrough
CT: control target
= control target key end

     0   :  { %s2381_s0 = inlined_call_operand.hbm [shape: f32[2,64,128], index: 0, kind: input, shape index: {}]   ;;  %s2382_s1 = inlined_call_operand.hbm [shape: f32[2,64,128], index: 1, kind: input, shape index: {}]   ;;  %s2383_s2 = inlined_call_operand.hbm [shape: f32[2,64,128], index: 2, kind: input, shape index: {}]   ;;  %s2384_s3 = inlined_call_operand.hbm [shape: f32[128,128], index: 3, kind: input, shape index: {}]   ;;  %s2385_s4 = inlined_call_operand.vmem [shape: f32[1,128], index: 4, kind: input, shape index: {}]   ;;  %s2386_s5 = inlined_call_operand.hbm [shape: f32[128,128], index: 5, kind: input, shape index: {}]   ;;  %s2387_s6 = inlined_call_operand.vmem [shape: f32[1,128], index: 6, kind: input, shape index: {}]   ;;  %s2388_s7 = inlined_call_operand.vmem [shape: f32[3,128], index: 7, kind: input, shape index: {}]   ;;  %s2389_s8 = inlined_call_operand.vmem [shape: f32[1,128], index: 8, kind: input, shape index: {}]   ;;  %s2390_s9 = inlined_call_operand.hbm [shape: f32[2,64,128], index: 9, kind: output, shape index: {0}]   ;;  %s2391_s10 = inlined_call_operand.hbm [shape: f32[2,4,1,128], index: 10, kind: output, shape index: {1}]   ;;  %s2392_s11 = inlined_call_operand.hbm [shape: f32[2,4,1,128], index: 11, kind: output, shape index: {2}]  }
   0x1   :  { %2414 = sst [smem:[#allocation35_spill]] %s2381_s0 }
   0x2   :  { %2415 = sst [smem:[#allocation36_spill]] %s2382_s1 }
   0x3   :  { %2416 = sst [smem:[#allocation37_spill]] %s2383_s2 }
   0x4   :  { %2417 = sst [smem:[#allocation38_spill]] %s2384_s3 }
   0x5   :  { %2418 = sst [smem:[#allocation39_spill]] %s2385_s4 }
   0x6   :  { %2419 = sst [smem:[#allocation40_spill]] %s2386_s5 }
   0x7   :  { %2420 = sst [smem:[#allocation41_spill]] %s2387_s6 }
   0x8   :  { %2421 = sst [smem:[#allocation42_spill]] %s2388_s7 }
   0x9   :  { %2422 = sst [smem:[#allocation43_spill]] %s2389_s8 }
   0xa   :  { %2423 = sst [smem:[#allocation44_spill]] %s2390_s9 }
   0xb   :  { %2424 = sst [smem:[#allocation45_spill]] %s2391_s10 }
   0xc   :  { %2425 = sst [smem:[#allocation46_spill]] %s2392_s11 }
   0xd   :  { %17 = vsyncpa [#allocation3], 0 }
   0xe   :  { %19 = vsyncpa [#allocation3 + $0x1], 0 }
   0xf   :  { %20 = vsyncpa [#allocation6], 0 }
  0x10   :  { %22 = vsyncpa [#allocation6 + $0x1], 0 }
  0x11   :  { %23 = vsyncpa [#allocation9], 0 }
  0x12   :  { %24 = vsyncpa [#allocation4], 0 }
  0x13   :  { %26 = vsyncpa [#allocation4 + $0x1], 0 }
  0x14   :  { %27 = vsyncpa [#allocation13], 0 }
  0x15   :  { %29 = vsyncpa [#allocation13 + $0x1], 0  ;;  %s1892_s17 = smov 0   ;;  %s1894_s18 = smov 0  }
  0x16   :  { %s1896_s19 = smov 0   ;;  %s1898_s20 = smov 0  }
  0x17   :  { %s1900_s21 = smov 0   ;;  %s1902_s22 = smov 0  }
  0x18   :  { %s1904_s23 = smov 0   ;;  %s1906_s24 = smov 0  }
  0x19   :  { %s1908_s25 = smov 0   ;;  %s1910_s26 = smov 0  }
  0x1a   :  { %s1912_s27 = smov 0   ;;  %s1914_s28 = smov 0  }
  0x1b   :  { %s1916_s29 = smov 0   ;;  %s1918_s30 = smov 0  }
  0x1c LB: > { %2426 = sst [smem:[#allocation21_spill]] %s1771_s17  ;;  %s1963_s12 = sadd.s32 4294967295, %s1823_s30   ;;  %s1823_s30 = sphi %s1918_s30, %s35_s30   ;;  %s1819_s29 = sphi %s1916_s29, %s2487_s29   ;;  %s1815_s28 = sphi %s1914_s28, %s2486_s28   ;;  %s1811_s27 = sphi %s1912_s27, %s2485_s27   ;;  %s1807_s26 = sphi %s1910_s26, %s2484_s26   ;;  %s1803_s25 = sphi %s1908_s25, %s2483_s25   ;;  %s1799_s24 = sphi %s1906_s24, %s2494_s24   ;;  %s1795_s23 = sphi %s1904_s23, %s2493_s23   ;;  %s1791_s22 = sphi %s1902_s22, %s2492_s22   ;;  %s1787_s21 = sphi %s1900_s21, %s2491_s21   ;;  %s1783_s20 = sphi %s1898_s20, %s2480_s20   ;;  %s1779_s19 = sphi %s1896_s19, %s2490_s19   ;;  %s1775_s18 = sphi %s1894_s18, %s2489_s18   ;;  %s1771_s17 = sphi %s1892_s17, %s2488_s17  }
  0x1d   : > { %2427 = sst [smem:[#allocation22_spill]] %s1787_s21  ;;  %p1188_p0 = scmp.ge.s32.totalorder %s1823_s30, 1 }
  0x1e   : > { %2428 = sst [smem:[#allocation23_spill]] %s1803_s25  ;;  %p70_p1 = scmp.eq.s32.totalorder %s1963_s12, 0 }
  0x1f   : > { %2429 = sst [smem:[#allocation24_spill]] %s1807_s26  ;;  %p362_p2 = scmp.lt.s32.totalorder %s1823_s30, 9 }
  0x20   : > { %2430 = sst [smem:[#allocation25_spill]] %s1811_s27  ;;  %s1825_s11 = smov [#allocation8]  }
  0x21   : > { %2431 = sst [smem:[#allocation26_spill]] %s1815_s28  ;;  %p1971_p3 = pnand %p1188_p0, %p362_p2 }
  0x22   : > { %2432 = sst [smem:[#allocation27_spill]] %s1819_s29  ;;  %s375_s10 = sshll.u32 %s1825_s11, 4  ;;  %s376_s10 = int_to_ptr.vmem [resolvable:$true] %s375_s10 }
  0x23   : > { %s2433_s3 = sld [smem:[#allocation38_spill]]  ;;  %p1284_p4 = pneg %p1971_p3 }
  0x24   : > { %s2434_s16 = scalar_select %p1971_p3, 1, 0 }
  0x25   : > { %p1979_p5 = pnand %p1284_p4, %p70_p1  ;;  %s2397_s13 = smov 128  }
  0x26   : > { %2435 = sst [smem:[#allocation28_spill]] %s2434_s16  ;;  %s2399_s14 = smov 8  }
  0x27   : > { %s47_s8 = sadd.s32 1, %s1819_s29  ;;  %p64_p7 = scmp.eq.s32.totalorder %s1823_s30, 0 }
  0x28   : > { %s1992_s11 = sshll.u32 %s1815_s28, 1  ;;  %p99_p12 = scmp.ne.s32.totalorder %s1791_s22, %s1787_s21 }
  0x29   : > { %s373_s15 = sshll.u32 %s2433_s3, 4  ;;  %s44_s3 = sadd.s32 1, %s1815_s28  ;;  %s374_s15 = int_to_ptr.hbm [resolvable:$true] %s373_s15 }
  0x2a   : > { %1287 = dma.hbm_to_vmem [thread:$0]  (!%p1979_p5), %s374_s15, 2048, %s376_s10, [#allocation9], %s2397_s13, %s2397_s13, %s2399_s14  }
  0x2b   : > { %p45_p6 = scmp.ge.s32.totalorder %s44_s3, 4  ;;  %s1183_s10 = sadd.s32 4294967295, %s1992_s11 }
  0x2c   : > { %p81_p9 = scmp.gt.s32.totalorder %s1183_s10, 0  ;;  %s92_s13 = sadd.s32 1, %s1791_s22 }
  0x2d   : > { %s2496_s3 = smov (%p45_p6, %s44_s3), 0  ;;  %s2498_s8 = smov (!%p45_p6, %s47_s8), %s1819_s29 }
  0x2e   : > { %2437 = sst [smem:[#allocation29_spill]] %s2496_s3  ;;  %s52_s27 = ssub.s32 %s1815_s28, %s2496_s3 }
  0x2f   : > { %p49_p8 = scmp.ge.s32.totalorder %s2498_s8, 2  ;;  %s1184_s15 = sshll.u32 %s2496_s3, 1 }
  0x30   : > { %s2502_s10 = smov (!%p81_p9, %s1183_s10), 0  ;;  %s1185_s7 = sadd.s32 4294967295, %s1184_s15 }
  0x31   : > { %s2500_s8 = smov (%p49_p8, %s2498_s8), 0  ;;  %p85_p10 = scmp.gt.s32.totalorder %s1185_s7, 0 }
  0x32   : > { %2438 = sst [smem:[#allocation30_spill]] %s2500_s8  ;;  %s2006_s14 = ssub.s32 %s1819_s29, %s2500_s8 }
  0x33   : > { %2439 = sst [smem:[#allocation31_spill]] %s2006_s14  ;;  %s2009_s28 = sor.u32 %s52_s27, %s2006_s14 }
  0x34   : > { %p54_p11 = scmp.eq.s32.totalorder %s2009_s28, 0  ;;  %s2504_s7 = smov (!%p85_p10, %s1185_s7), 0 }
  0x35   : > { %p2016_p13 = por %p99_p12, %p64_p7  ;;  %p105_p0 = scmp.ne.s32.totalorder %s1787_s21, %s1783_s20 }
  0x36   : > { %s88_s8 = ssub.s32 %s2502_s10, %s2504_s7  ;;  %s2022_s4 = sadd.s32 2, %s1184_s15 }
  0x37   : > { %s89_s27 = sor.u32 %s88_s8, %s2006_s14  ;;  %p2027_p2 = por %p105_p0, %p70_p1 }
  0x38   : > { %p90_p4 = scmp.eq.s32.totalorder %s89_s27, 0  ;;  %p121_p6 = scmp.lt.s32.totalorder %s2022_s4, 7 }
  0x39   : > { %s2441_s26 = scalar_select %p2027_p2, 1, 0 }
  0x3a   : > { %p2412_p8 = scmp.lt.s32.totalorder %s1823_s30, 8  ;;  %s2034_s6 = sshll.u32 %s1819_s29, 3 }
  0x3b   : > { %2442 = sst [smem:[#allocation32_spill]] %s2441_s26  ;;  %s424_s7 = sadd.s32 %s2034_s6, %s1992_s11 }
  0x3c   : > { %s2037_s20 = scalar_select %p90_p4, %s1791_s22, %s92_s13  }
  0x3d   : > { %s439_s15 = sand.u32 1, %s1823_s30   ;;  %s441_s21 = sand.u32 1, %s1791_s22  }
  0x3e   : > { %2443 = sst [smem:[#allocation33_spill]] %s2037_s20  ;;  %s1196_s8 = sshll.u32 %s441_s21, 3 }
  0x3f   : > { %s451_s16 = sadd.s32 %s2034_s6, %s2502_s10  ;;  %s2444_s1 = sld [smem:[#allocation36_spill]] }
  0x40   : > { %s1200_s2 = sshll.u32 %s451_s16, 3  ;;  %s443_s17 = scalar_lea.vmem [#allocation5], %s1196_s8 }
  0x41   : > { %s457_s29 = sshll.u32 %s443_s17, 4  ;;  %p1295_p9 = pnand %p2412_p8, %p2016_p13  ;;  %s458_s29 = int_to_ptr.vmem [resolvable:$true] %s457_s29 }
  0x42   : > { %s2445_s5 = sld [smem:[#allocation40_spill]]  ;;  %s2054_s17 = scalar_lea.sflag [#allocation6], %s439_s15 }
  0x43   : > { %s1828_s16 = smov [#allocation10]   ;;  %s2446_s3 = smov 8  }
  0x44   : > { %s392_s14 = sshll.u32 %s1828_s16, 4  ;;  %s2447_s10 = smov 128   ;;  %s393_s14 = int_to_ptr.vmem [resolvable:$true] %s392_s14 }
  0x45   : > { %s453_s27 = scalar_lea.hbm %s2444_s1, %s1200_s2  ;;  %s2411_s8 = sadd.s32 4294967294, %s1823_s30  }
  0x46   : > { %s455_s13 = sshll.u32 %s453_s27, 4  ;;  %s56_s27 = sadd.s32 1, %s1803_s25  ;;  %s456_s13 = int_to_ptr.hbm [resolvable:$true] %s455_s13 }
  0x47   : > { %1297 = dma.hbm_to_vmem [thread:$0]  (!%p1295_p9), %s456_s13, 128, %s458_s29, %s2054_s17  }
  0x48   : > { %s390_s2 = sshll.u32 %s2445_s5, 4  ;;  %p63_p10 = scmp.ne.s32.totalorder %s1803_s25, %s1799_s24  ;;  %s391_s2 = int_to_ptr.hbm [resolvable:$true] %s390_s2 }
  0x49   : > { %1290 = dma.hbm_to_vmem [thread:$0]  (!%p1979_p5), %s391_s2, 2048, %s393_s14, [#allocation9], %s2447_s10, %s2447_s10, %s2446_s3  }
  0x4a   : > { %s2067_s21 = scalar_select %p54_p11, %s1803_s25, %s56_s27  }
  0x4b   : > { %p69_p12 = scmp.ne.s32.totalorder %s1799_s24, %s1795_s23  ;;  %p293_p13 = scmp.eq.s32.totalorder %s1963_s12, 7 }
  0x4c   : > { %2448 = sst [smem:[#allocation34_spill]] %s2067_s21  ;;  %p299_p0 = scmp.eq.s32.totalorder %s2411_s8, 7 }
  0x4d   : > { %p2078_p4 = por %p64_p7, %p63_p10  ;;  %p2084_p5 = por %p70_p1, %p69_p12 }
  0x4e   : > { %p2088_p11 = por %p293_p13, %p63_p10  ;;  %p2092_p9 = por %p299_p0, %p69_p12 }
  0x4f   : > { %s415_s13 = sand.u32 1, %s1803_s25   ;;  %s1195_s26 = sshll.u32 %s424_s7, 3 }
  0x50   : > { %s1192_s2 = sshll.u32 %s415_s13, 4  ;;  %s2453_s0 = sld [smem:[#allocation35_spill]] }
  0x51   : > { %s2454_s8 = sld [smem:[#allocation21_spill]]  ;;  %s419_s5 = scalar_lea.vmem [#allocation2], %s1192_s2 }
  0x52   : > { %s429_s21 = sshll.u32 %s419_s5, 4  ;;  %s2455_s20 = sld [smem:[#allocation31_spill]]  ;;  %s430_s21 = int_to_ptr.vmem [resolvable:$true] %s429_s21 }
  0x53   : > { %p1292_p10 = pnand %p2412_p8, %p2078_p4  ;;  %s416_s7 = scalar_lea.sflag [#allocation3], %s415_s13 }
  0x54   : > { %s128_s16 = sadd.s32 1, %s1779_s19  ;;  %p135_p13 = scmp.ne.s32.totalorder %s1779_s19, %s1775_s18 }
  0x55   : > { %s2506_s4 = smov (!%p121_p6, %s2022_s4), 7  ;;  %s466_s13 = sand.u32 1, %s1779_s19  }
  0x56   : > { %s426_s27 = scalar_lea.hbm %s2453_s0, %s1195_s26  ;;  %s1227_s26 = sadd.s32 2, %s1992_s11 }
  0x57   : > { %s427_s1 = sshll.u32 %s426_s27, 4  ;;  %p117_p12 = scmp.lt.s32.totalorder %s1227_s26, 7  ;;  %s428_s1 = int_to_ptr.hbm [resolvable:$true] %s427_s1 }
  0x58   : > { %1294 = dma.hbm_to_vmem [thread:$0]  (!%p1292_p10), %s428_s1, 256, %s430_s21, %s416_s7, %s2447_s10, %s2447_s10, %s2446_s3  }
  0x59   : > { %s2508_s26 = smov (!%p117_p12, %s1227_s26), 7  ;;  %p2119_p0 = por %p135_p13, %p64_p7 }
  0x5a   : > { %p141_p4 = scmp.ne.s32.totalorder %s1775_s18, %s2454_s8  ;;  %s124_s29 = ssub.s32 %s2508_s26, %s2506_s4 }
  0x5b   : > { %s125_s1 = sor.u32 %s124_s29, %s2455_s20  ;;  %s1201_s3 = sshll.u32 %s466_s13, 3 }
  0x5c   : > { %p2129_p10 = por %p141_p4, %p70_p1  ;;  %p126_p8 = scmp.eq.s32.totalorder %s125_s1, 0 }
  0x5d   : > { %s476_s10 = sadd.s32 %s2034_s6, %s2508_s26  ;;  %s468_s14 = scalar_lea.vmem [#allocation7], %s1201_s3 }
  0x5e   : > { %s2135_s21 = scalar_select %p126_p8, %s1779_s19, %s128_s16  }
  0x5f   : > { %s1204_s2 = sshll.u32 %s476_s10, 3  ;;  %s482_s27 = sshll.u32 %s468_s14, 4  ;;  %s483_s27 = int_to_ptr.vmem [resolvable:$true] %s482_s27 }
  0x60   : > { %s2458_s8 = sld [smem:[#allocation37_spill]]  ;;  %p2459_p7 = scmp.lt.s32.totalorder %s1823_s30, 8 }
  0x61   : > { %s2148_s6 = sand.u32 (!%p1971_p3), 1, %s1799_s24  }
  0x62   : > { %p1298_p6 = pnand %p2459_p7, %p2119_p0  ;;  %s1206_s26 = sshll.u32 (!%p1971_p3), %s2148_s6, 4 }
  0x63   : > { %s494_s0 = scalar_lea.sflag (!%p1971_p3), [#allocation3], %s2148_s6  ;;  %s2154_s16 = scalar_lea.vmem (!%p1971_p3), [#allocation2], %s1206_s26 }
  0x64   : > { %491 = sbr.rel (%p1971_p3) target bundleno = 373 (0x175), region = 56 }
  0x66   : > { %s478_s4 = scalar_lea.hbm %s2458_s8, %s1204_s2 }
  0x67   : > { %s480_s25 = sshll.u32 %s478_s4, 4  ;;  %s481_s25 = int_to_ptr.hbm [resolvable:$true] %s480_s25 }
  0x68   : > { %1300 = dma.hbm_to_vmem [thread:$0]  (!%p1298_p6), %s481_s25, 128, %s483_s27, %s2054_s17  }
  0x69   : > { %1746 = dma.done.wait (%p2084_p5), %s494_s0, 256  }
  0x6a   : > { %1748 = vsyncadd (%p2084_p5), %s494_s0, 4294967040  ;;  %s2461_s25 = sld [smem:[#allocation22_spill]]  ;;  %s503_s5 = sand.u32 1, %s1963_s12  }
  0x6b   : > { %s504_s1 = scalar_lea.sflag [#allocation6], %s503_s5 }
  0x70   : > { %s505_s29 = sand.u32 1, %s2461_s25  }
  0x71   : > { %s2162_s13 = sshll.u32 %s505_s29, 3 }
  0x72   : > { %s507_s3 = scalar_lea.vmem [#allocation5], %s2162_s13 }
  0x73   : > { %1750 = dma.done.wait (%p2027_p2), %s504_s1, 128  }
  0x74   : > { %1752 = vsyncadd (%p2027_p2), %s504_s1, 4294967168  ;;  %s515_s9 = sand.u32 1, %s1775_s18  }
  0x75   : > { %s2172_s10 = sshll.u32 %s515_s9, 3 }
  0x76   : > { %s517_s2 = scalar_lea.vmem [#allocation7], %s2172_s10 }
  0x77   : > { %1754 = dma.done.wait (%p2129_p10), %s504_s1, 128  }
  0x78   : > { %1756 = vsyncadd (%p2129_p10), %s504_s1, 4294967168 }
  0x79   : > { %1758 = dma.done.wait (%p70_p1), [#allocation9], 4096  }
  0x7a   : > { %1760 = vsyncadd (%p70_p1), [#allocation9], 4294963200  ;;  %v663_v0 = vld [vmem:[#allocation10 + $0x78] sm:$0xff]  ;;  %v662_v1 = vld [vmem:[#allocation10 + $0x70] sm:$0xff]  ;;  %s2463_s27 = sld [smem:[#allocation41_spill]]  ;;  %vm832_vm14 = vcmask 1046528  }
  0x7b   : > { %668 = vmatpush.msra.mxu1 %v663_v0  ;;  %1248 = vmatpush.msra.mxu3 %v663_v0  ;;  %v661_v2 = vld [vmem:[#allocation10 + $0x68] sm:$0xff]  ;;  %v660_v3 = vld [vmem:[#allocation10 + $0x60] sm:$0xff]  ;;  %v614_v4 = vld [vmem:[#allocation8 + $0x78] sm:$0xff]  ;;  %s2464_s7 = sld [smem:[#allocation24_spill]] }
  0x7c   : > { %v613_v5 = vld [vmem:[#allocation8 + $0x70] sm:$0xff]  ;;  %v659_v6 = vld [vmem:[#allocation10 + $0x58] sm:$0xff]  ;;  %619 = vmatpush.msra.mxu0 %v614_v4  ;;  %1232 = vmatpush.msra.mxu2 %v614_v4  ;;  %v612_v7 = vld [vmem:[#allocation8 + $0x68] sm:$0xff]  ;;  %s2465_s0 = sld [smem:[#allocation39_spill]] }
  0x7d   : > { %669 = vmatpush.msra.mxu1 %v662_v1  ;;  %1249 = vmatpush.msra.mxu3 %v662_v1  ;;  %v658_v8 = vld [vmem:[#allocation10 + $0x50] sm:$0xff]  ;;  %v611_v9 = vld [vmem:[#allocation8 + $0x60] sm:$0xff]  ;;  %v657_v10 = vld [vmem:[#allocation10 + $0x48] sm:$0xff]  ;;  %s2466_s17 = sld [smem:[#allocation42_spill]] }
  0x7e   : > { %620 = vmatpush.msra.mxu0 %v613_v5  ;;  %1233 = vmatpush.msra.mxu2 %v613_v5  ;;  %v656_v11 = vld [vmem:[#allocation10 + $0x40] sm:$0xff]  ;;  %v610_v12 = vld [vmem:[#allocation8 + $0x58] sm:$0xff]  ;;  %v609_v13 = vld [vmem:[#allocation8 + $0x50] sm:$0xff]  ;;  %s2471_s13 = sld [smem:[#allocation25_spill]] }
  0x7f   : > { %670 = vmatpush.msra.mxu1 %v661_v2  ;;  %1250 = vmatpush.msra.mxu3 %v661_v2  ;;  %v655_v14 = vld [vmem:[#allocation10 + $0x38] sm:$0xff]  ;;  %v608_v15 = vld [vmem:[#allocation8 + $0x48] sm:$0xff]  ;;  %v654_v16 = vld [vmem:[#allocation10 + $0x30] sm:$0xff]  ;;  %s2473_s20 = sld [smem:[#allocation44_spill]] }
  0x80   : > { %621 = vmatpush.msra.mxu0 %v612_v7  ;;  %1234 = vmatpush.msra.mxu2 %v612_v7  ;;  %v607_v17 = vld [vmem:[#allocation8 + $0x40] sm:$0xff]  ;;  %v653_v18 = vld [vmem:[#allocation10 + $0x28] sm:$0xff]  ;;  %v606_v19 = vld [vmem:[#allocation8 + $0x38] sm:$0xff] }
  0x81   : > { %671 = vmatpush.msra.mxu1 %v660_v3  ;;  %1251 = vmatpush.msra.mxu3 %v660_v3  ;;  %v652_v20 = vld [vmem:[#allocation10 + $0x20] sm:$0xff]  ;;  %v605_v21 = vld [vmem:[#allocation8 + $0x30] sm:$0xff]  ;;  %v651_v22 = vld [vmem:[#allocation10 + $0x18] sm:$0xff]  ;;  %p782_p1 = scmp.gt.s32.totalorder %s2464_s7, 0  ;;  %p794_p3 = scmp.lt.s32.totalorder %s2464_s7, 3 }
  0x82   : > { %622 = vmatpush.msra.mxu0 %v611_v9  ;;  %1235 = vmatpush.msra.mxu2 %v611_v9  ;;  %v604_v23 = vld [vmem:[#allocation8 + $0x28] sm:$0xff]  ;;  %v650_v24 = vld [vmem:[#allocation10 + $0x10] sm:$0xff]  ;;  %v603_v25 = vld [vmem:[#allocation8 + $0x20] sm:$0xff]  ;;  %s1219_s1 = sshll.u32 %s2464_s7, 1 }
  0x83   : > { %672 = vmatpush.msra.mxu1 %v659_v6  ;;  %1252 = vmatpush.msra.mxu3 %v659_v6  ;;  %v649_v26 = vld [vmem:[#allocation10 + $0x8] sm:$0xff]  ;;  %v602_v27 = vld [vmem:[#allocation8 + $0x18] sm:$0xff]  ;;  %v648_v28 = vld [vmem:[#allocation10] sm:$0xff]  ;;  %s787_s8 = scalar_select %p782_p1, 1, 0 }
  0x84   : > { %623 = vmatpush.msra.mxu0 %v610_v12  ;;  %1236 = vmatpush.msra.mxu2 %v610_v12  ;;  %v595_v29 = vld [vmem:[%s507_s3] sm:$0xff]  ;;  %v597_v30 = vld [vmem:[%s2154_s16 + $0x8] sm:$0xff]  ;;  %v601_v31 = vld [vmem:[#allocation8 + $0x10] sm:$0xff]  ;;  %s2226_s29 = scalar_select %p794_p3, 1, 0 }
  0x85   : > { %673 = vmatpush.msra.mxu1 %v658_v8  ;;  %1253 = vmatpush.msra.mxu3 %v658_v8  ;;  %v600_v32 = vld [vmem:[#allocation8 + $0x8] sm:$0xff]  ;;  %v599_v33 = vld [vmem:[#allocation8] sm:$0xff]  ;;  %v598_v35 = vld [vmem:[%s517_s2] sm:$0xff]  ;;  %v788_v62 = vstv %s787_s8  ;;  %s1220_s3 = sshll.u32 %s2471_s13, 3  ;;  %s2472_s2 = sld [smem:[#allocation43_spill]] }
  0x86   : > { %624 = vmatpush.msra.mxu0 %v609_v13  ;;  %1237 = vmatpush.msra.mxu2 %v609_v13  ;;  %v596_v34 = vld [vmem:[%s2154_s16] sm:$0xff]  ;;  %vm2214_vm3 = vcmp.eq.s32.totalorder %v788_v62, 1  ;;  %s931_s11 = sadd.s32 %s1220_s3, %s1219_s1 }
  0x87   : > { %674 = vmatpush.msra.mxu1 %v657_v10  ;;  %1254 = vmatpush.msra.mxu3 %v657_v10  ;;  %v1436_v36 = vld [vmem:[%s2463_s27] ss:$0 sm:$0xff]  ;;  %s1221_s14 = sshll.u32 %s931_s11, 3  ;;  %s572_s27 = scalar_lea.vmem [#allocation11], %s1206_s26 }
  0x88   : > { %625 = vmatpush.msra.mxu0 %v608_v15  ;;  %1238 = vmatpush.msra.mxu2 %v608_v15  ;;  %v2199_v60 = vld [vmem:[%s2465_s0] ss:$0 sm:$0xff]  ;;  %s2474_s0 = smov %s2473_s20  ;;  %s933_s16 = scalar_lea.hbm %s2473_s20, %s1221_s14 }
  0x89   : > { %675 = vmatpush.msra.mxu1 %v656_v11  ;;  %1255 = vmatpush.msra.mxu3 %v656_v11  ;;  %v2207_v4 = vld [vmem:[%s2466_s17] sm:$0x7]  ;;  %s934_s25 = sshll.u32 %s572_s27, 4  ;;  %s936_s17 = sshll.u32 %s933_s16, 4  ;;  %s2259_s25 = int_to_ptr.vmem [resolvable:$true] %s934_s25  ;;  %s937_s17 = int_to_ptr.hbm [resolvable:$true] %s936_s17 }
  0x8a   : > { %626 = vmatpush.msra.mxu0 %v607_v17  ;;  %1239 = vmatpush.msra.mxu2 %v607_v17  ;;  %v827_v10 = vperm.slane %v2207_v4, 1  ;;  %s912_s26 = scalar_lea.sflag [#allocation4], %s2148_s6  ;;  %s1625_s10 = scalar_lea.hbm %s2474_s0, 128 }
  0x8b   : > { %676 = vmatpush.msra.mxu1 %v655_v14  ;;  %1256 = vmatpush.msra.mxu3 %v655_v14 }
  0x8c   : > { %627 = vmatpush.msra.mxu0 %v606_v19  ;;  %1240 = vmatpush.msra.mxu2 %v606_v19 }
  0x8d   : > { %677 = vmatpush.msra.mxu1 %v654_v16  ;;  %1257 = vmatpush.msra.mxu3 %v654_v16 }
  0x8e   : > { %628 = vmatpush.msra.mxu0 %v605_v21  ;;  %1241 = vmatpush.msra.mxu2 %v605_v21 }
  0x8f   : > { %678 = vmatpush.msra.mxu1 %v653_v18  ;;  %1258 = vmatpush.msra.mxu3 %v653_v18 }
  0x90   : > { %629 = vmatpush.msra.mxu0 %v604_v23  ;;  %1242 = vmatpush.msra.mxu2 %v604_v23 }
  0x91   : > { %679 = vmatpush.msra.mxu1 %v652_v20  ;;  %1259 = vmatpush.msra.mxu3 %v652_v20 }
  0x92   : > { %630 = vmatpush.msra.mxu0 %v603_v25  ;;  %1243 = vmatpush.msra.mxu2 %v603_v25 }
  0x93   : > { %680 = vmatpush.msra.mxu1 %v651_v22  ;;  %1260 = vmatpush.msra.mxu3 %v651_v22 }
  0x94   : > { %631 = vmatpush.msra.mxu0 %v602_v27  ;;  %1244 = vmatpush.msra.mxu2 %v602_v27 }
  0x95   : > { %681 = vmatpush.msra.mxu1 %v650_v24  ;;  %1261 = vmatpush.msra.mxu3 %v650_v24 }
  0x96   : > { %632 = vmatpush.msra.mxu0 %v601_v31  ;;  %1245 = vmatpush.msra.mxu2 %v601_v31 }
  0x97   : > { %682 = vmatpush.msra.mxu1 %v649_v26  ;;  %1262 = vmatpush.msra.mxu3 %v649_v26 }
  0x98   : > { %633 = vmatpush.msra.mxu0 %v600_v32  ;;  %1246 = vmatpush.msra.mxu2 %v600_v32 }
  0x99   : > { %683 = vmatpush.msra.mxu1 %v648_v28  ;;  %1263 = vmatpush.msra.mxu3 %v648_v28 }
  0x9a   : > { %684 = vmatmul.f32.vlgmr.msra.gmra.mxu1 %v595_v29  ;;  %690 = vmatmul.f32.vlgmr.msra.gmra.mxu3 %v597_v30 }
  0x9b   : > { %634 = vmatpush.msra.mxu0 %v599_v33  ;;  %1247 = vmatpush.msra.mxu2 %v599_v33 }
  0x9c   : > { %635 = vmatmul.f32.vlgmr.msra.gmra.mxu0 %v595_v29  ;;  %641 = vmatmul.f32.vlgmr.msra.gmra.mxu2 %v597_v30  ;;  %v800_v30 = vstv %s2226_s29  ;;  %s1619_s29 = sshra.s32 %s937_s17, 4  ;;  %s1620_s29 = int_to_ptr.hbm [resolvable:$true] %s1619_s29 }
  0x9d   : > { %vm801_vm13 = vcmp.eq.s32.totalorder %v800_v30, 1  ;;  %s1621_s1 = scalar_lea.hbm %s1620_s29, 16  ;;  %p1626_p12 = scmp.lt.s32.totalorder %s1620_s29, %s2474_s0 }
  0x9e   : > { %p1622_p2 = scmp.ne.s32.totalorder %s1620_s29, %s1621_s1  ;;  %p1627_p13 = scmp.lt.s32.totalorder %s1625_s10, %s1621_s1 }
  0xa0   : > { %p1623_p8 = pnand %p1622_p2, %p2088_p11  ;;  %p1628_p0 = por %p1627_p13, %p1626_p12 }
  0xa2   : > { %687 = vmatmul.f32.gmra.mxu1 %v596_v34  ;;  %693 = vmatmul.f32.gmra.mxu3 %v598_v35  ;;  %p1624_p5 = pneg %p1623_p8 }
  0xa4   : > { %638 = vmatmul.f32.gmra.mxu0 %v596_v34  ;;  %644 = vmatmul.f32.gmra.mxu2 %v598_v35  ;;  %v1829_v35 = vmov 0.0   ;;  %p1629_p4 = pnand %p1628_p0, %p1624_p5 }
 0x117   : > { %v685_v37 = vpop.f32.mrf.mxu1 }
 0x118   : > { %v686_v38 = vadd.f32 %v1436_v36, %v685_v37 }
 0x119   : > { %v636_v56 = vpop.f32.mrf.mxu0 }
 0x11a   : > { %v1212_v39 = vmul.f32 -1.442695, %v686_v38  ;;  %v637_v11 = vadd.f32 %v2199_v60, %v636_v56  ;;  %v842_v38 = vperm.slane %v2207_v4, 2 }
 0x11c   : > { %1439 = vpow2.f32 %v1212_v39 }
 0x11d   : > { %v691_v40 = vpop.f32.mrf.mxu3 }
 0x11e   : > { %v692_v41 = vadd.f32 %v1436_v36, %v691_v40 }
 0x11f   : > { %v688_v42 = vpop.f32.mrf.mxu1  ;;  %v642_v5 = vpop.f32.mrf.mxu2 }
 0x120   : > { %v1214_v43 = vmul.f32 -1.442695, %v692_v41  ;;  %v689_v44 = vadd.f32 %v1436_v36, %v688_v42  ;;  %v643_v16 = vadd.f32 %v2199_v60, %v642_v5 }
 0x121   : > { %v639_v20 = vpop.f32.mrf.mxu0 }
 0x122   : > { %v1440_v45 = vpop.eup %1439  ;;  %1441 = vpow2.f32 %v1214_v43  ;;  %v1213_v46 = vmul.f32 -1.442695, %v689_v44  ;;  %v640_v29 = vadd.f32 %v2199_v60, %v639_v20  ;;  %v823_v43 = vperm.slane %v2207_v4, 0 }
 0x123   : > { %v709_v47 = vadd.f32 1.0, %v1440_v45 }
 0x124   : > { %1443 = vpow2.f32 %v1213_v46 }
 0x125   : > { %1445 = vrcp.f32 %v709_v47  ;;  %v694_v48 = vpop.f32.mrf.mxu3  ;;  %vm718_vm0 = vweird.f32 %v709_v47  ;;  %v724_v1 = vand.u32 2147483648, %v709_v47  ;;  %v722_v3 = vand.u32 2147483647, %v709_v47 }
 0x126   : > { %v695_v49 = vadd.f32 %v1436_v36, %v694_v48  ;;  %v1216_v36 = vsel %vm2214_vm3, 1.0, %v1829_v35 }
 0x127   : > { %v725_v15 = vor.u32 1.1754944e-38, %v724_v1  ;;  %vm723_vm4 = vcmp.eq.f32.partialorder %v722_v3, 8.507059e+37  ;;  %v645_v48 = vpop.f32.mrf.mxu2 }
 0x128   : > { %v1442_v50 = vpop.eup %1441  ;;  %v1215_v51 = vmul.f32 -1.442695, %v695_v49  ;;  %v646_v56 = vadd.f32 %v2199_v60, %v645_v48 }
 0x129   : > { %v711_v52 = vadd.f32 1.0, %v1442_v50 }
 0x12a   : > { %v1444_v53 = vpop.eup %1443  ;;  %1447 = vpow2.f32 %v1215_v51 }
 0x12b   : > { %v1446_v54 = vpop.eup %1445  ;;  %1449 = vrcp.f32 %v711_v52  ;;  %v2193_v55 = vadd.f32 1.0, %v1444_v53  ;;  %v752_v17 = vand.u32 2147483647, %v711_v52  ;;  %v754_v18 = vand.u32 2147483648, %v711_v52 }
 0x12c   : > { %v714_v57 = vmul.f32 %v1446_v54, %v709_v47  ;;  %vm719_vm1 = vweird.f32 %v1446_v54  ;;  %vm748_vm6 = vweird.f32 %v711_v52 }
 0x12d   : > { %1451 = vrcp.f32 %v2193_v55  ;;  %vm2210_vm2 = vmor %vm718_vm0, %vm719_vm1  ;;  %vm733_vm7 = vweird.f32 %v2193_v55  ;;  %v739_v23 = vand.u32 2147483648, %v2193_v55  ;;  %v737_v26 = vand.u32 2147483647, %v2193_v55 }
 0x12e   : > { %v715_v58 = vsub.f32 1.0, %v714_v57  ;;  %vm753_vm10 = vcmp.eq.f32.partialorder %v752_v17, 8.507059e+37  ;;  %v755_v28 = vor.u32 1.1754944e-38, %v754_v18  ;;  %vm849_vm0 = vcmask 1045504  }
 0x12f   : > { %v740_v39 = vor.u32 1.1754944e-38, %v739_v23  ;;  %vm738_vm12 = vcmp.eq.f32.partialorder %v737_v26, 8.507059e+37 }
 0x130   : > { %v1448_v59 = vpop.eup %1447  ;;  %v716_v61 = vmul.f32 %v1446_v54, %v715_v58 }
 0x131   : > { %v1450_v63 = vpop.eup %1449  ;;  %v2201_v0 = vadd.f32 1.0, %v1448_v59 }
 0x132   : > { %v717_v2 = vadd.f32 %v1446_v54, %v716_v61  ;;  %v744_v6 = vmul.f32 %v1450_v63, %v711_v52  ;;  %vm749_vm5 = vweird.f32 %v1450_v63 }
 0x133   : > { %v1452_v7 = vpop.eup %1451  ;;  %1453 = vrcp.f32 %v2201_v0  ;;  %vm750_vm9 = vmor %vm748_vm6, %vm749_vm5  ;;  %v769_v49 = vand.u32 2147483648, %v2201_v0  ;;  %v767_v51 = vand.u32 2147483647, %v2201_v0  ;;  %vm763_vm1 = vweird.f32 %v2201_v0 }
 0x134   : > { %v721_v12 = vsel %vm2210_vm2, %v1446_v54, %v717_v2  ;;  %v745_v13 = vsub.f32 1.0, %v744_v6  ;;  %v729_v14 = vmul.f32 %v1452_v7, %v2193_v55  ;;  %vm734_vm8 = vweird.f32 %v1452_v7 }
 0x135   : > { %v726_v22 = vsel %vm723_vm4, %v725_v15, %v721_v12  ;;  %vm735_vm11 = vmor %vm733_vm7, %vm734_vm8  ;;  %v1217_v54 = vsel %vm801_vm13, 1.0, %v1829_v35  ;;  %v770_v62 = vor.u32 1.1754944e-38, %v769_v49  ;;  %vm768_vm3 = vcmp.eq.f32.partialorder %v767_v51, 8.507059e+37 }
 0x136   : > { %v746_v19 = vmul.f32 %v1450_v63, %v745_v13  ;;  %v730_v21 = vsub.f32 1.0, %v729_v14  ;;  %v773_v31 = vmul.f32 %v726_v22, %v637_v11  ;;  %vm874_vm4 = vcmask 1040384  }
 0x138   : > { %v747_v24 = vadd.f32 %v1450_v63, %v746_v19  ;;  %v731_v25 = vmul.f32 %v1452_v7, %v730_v21  ;;  %v818_v45 = vmul.f32 %v1216_v36, %v773_v31 }
 0x139   : > { %v1454_v27 = vpop.eup %1453 }
 0x13a   : > { %v751_v32 = vsel %vm750_vm9, %v1450_v63, %v747_v24  ;;  %v732_v33 = vadd.f32 %v1452_v7, %v731_v25  ;;  %v759_v34 = vmul.f32 %v1454_v27, %v2201_v0  ;;  %vm764_vm15 = vweird.f32 %v1454_v27  ;;  %v1438_v0 = vld [vmem:[%s2472_s2] ss:$0 sm:$0xff] }
 0x13b   : > { %v756_v37 = vsel %vm753_vm10, %v755_v28, %v751_v32  ;;  %v824_v58 = vmul.f32 %v823_v43, %v818_v45  ;;  %vm765_vm2 = vmor %vm763_vm1, %vm764_vm15 }
 0x13c   : > { %v775_v40 = vmul.f32 %v756_v37, %v643_v16  ;;  %v736_v41 = vsel %vm735_vm11, %v1452_v7, %v732_v33  ;;  %v760_v42 = vsub.f32 1.0, %v759_v34 }
 0x13d   : > { %v741_v44 = vsel %vm738_vm12, %v740_v39, %v736_v41 }
 0x13e   : > { %v829_v46 = vmul.f32 %v827_v10, %v775_v40  ;;  %v774_v47 = vmul.f32 %v741_v44, %v640_v29  ;;  %v761_v50 = vmul.f32 %v1454_v27, %v760_v42  ;;  %v844_v52 = vmul.f32 %v842_v38, %v775_v40 }
 0x13f   : > { %v826_v15 = vmul.f32 %v823_v43, %v775_v40 }
 0x140   : > { %v828_v53 = vmul.f32 %v827_v10, %v774_v47  ;;  %v843_v55 = vmul.f32 %v842_v38, %v774_v47  ;;  %v762_v57 = vadd.f32 %v1454_v27, %v761_v50  ;;  %v834_v59 = vrot.slane %v829_v46, 1 }
 0x141   : > { %v825_v63 = vmul.f32 %v823_v43, %v774_v47  ;;  %v851_v3 = vrot.slane %v844_v52, 2 }
 0x142   : > { %v833_v61 = vrot.slane %v828_v53, 1  ;;  %v850_v1 = vrot.slane %v843_v55, 2  ;;  %v766_v2 = vsel %vm765_vm2, %v1454_v27, %v762_v57  ;;  %v841_v17 = vadd.f32 %v834_v59, %v826_v15 }
 0x143   : > { %v771_v5 = vsel %vm768_vm3, %v770_v62, %v766_v2 }
 0x144   : > { %v835_v4 = vsel %vm832_vm14, %v833_v61, %v834_v59  ;;  %v839_v60 = vadd.f32 %v833_v61, %v824_v58  ;;  %v776_v7 = vmul.f32 %v771_v5, %v646_v56  ;;  %v852_v8 = vsel %vm849_vm0, %v850_v1, %v851_v3 }
 0x145   : > { %v840_v6 = vadd.f32 %v835_v4, %v825_v63 }
 0x146   : > { %v858_v9 = vadd.f32 %v850_v1, %v839_v60  ;;  %v821_v11 = vmul.f32 %v1217_v54, %v776_v7 }
 0x147   : > { %v859_v10 = vadd.f32 %v852_v8, %v840_v6 }
 0x148   : > { %v865_v12 = vadd.f32 %v1438_v0, %v858_v9  ;;  %v845_v14 = vmul.f32 %v842_v38, %v821_v11 }
 0x149   : > { %v866_v13 = vadd.f32 %v1438_v0, %v859_v10 }
 0x14a   : > { %868 = vst [vmem:[%s572_s27 - $0x7] sm:$0x80] %v865_v12  ;;  %v853_v16 = vrot.slane %v845_v14, 2  ;;  %v890_v19 = vmul.f32 %v865_v12, %v865_v12  ;;  %v875_v22 = vrot.slane %v865_v12, 7 }
 0x14b   : > { %869 = vst [vmem:[%s572_s27 + $0x1] sm:$0xff] %v866_v13  ;;  %v891_v20 = vmul.f32 %v866_v13, %v866_v13  ;;  %v876_v23 = vrot.slane %v866_v13, 7 }
 0x14c   : > { %v854_v18 = vsel %vm849_vm0, %v851_v3, %v853_v16  ;;  %v896_v25 = vrot.slane %v890_v19, 7 }
 0x14d   : > { %v860_v21 = vadd.f32 %v854_v18, %v841_v17  ;;  %v897_v26 = vrot.slane %v891_v20, 7 }
 0x14f   : > { %v867_v24 = vadd.f32 %v1438_v0, %v860_v21 }
 0x151   : > { %870 = vst [vmem:[%s572_s27 + $0x9] sm:$0x7f] %v867_v24  ;;  %v878_v27 = vrot.slane %v867_v24, 7  ;;  %v892_v28 = vmul.f32 %v867_v24, %v867_v24 }
 0x152   : > { %1632 = shalt.err (!%p1629_p4)
}
 0x153   : > { %s1830_s14 = smov 128   ;;  %s1831_s27 = smov 8   ;;  %v899_v29 = vrot.slane %v892_v28, 7  ;;  %v877_v30 = vsel %vm874_vm4, %v875_v22, %v876_v23  ;;  %v879_v31 = vsel %vm874_vm4, %v876_v23, %v878_v27  ;;  %v898_v33 = vsel %vm874_vm4, %v896_v25, %v897_v26 }
 0x154   : > { %1278 = dma.vmem_to_hbm [thread:$0]  (%p2088_p11), %s2259_s25, 256, %s937_s17, %s912_s26, %s1830_s14, %s1830_s14, %s1831_s27   ;;  %v882_v32 = vadd.f32 %v879_v31, %v877_v30 }
 0x155   : > { %s1222_s8 = sshll.u32 %s2471_s13, 2  ;;  %v900_v34 = vsel %vm874_vm4, %v897_v26, %v899_v29  ;;  %s2475_s25 = sld [smem:[#allocation45_spill]] }
 0x156   : > { %v883_v35 = vrot.slane %v882_v32, 4  ;;  %v903_v36 = vadd.f32 %v900_v34, %v898_v33  ;;  %s949_s4 = sadd.s32 %s2464_s7, %s1222_s8  ;;  %s2477_s13 = sld [smem:[#allocation46_spill]] }
 0x157   : > { %s578_s9 = scalar_lea.vmem [#allocation12], %s2148_s6  ;;  %s584_s11 = scalar_lea.vmem [#allocation14], %s2148_s6 }
 0x158   : > { %v884_v37 = vadd.f32 %v883_v35, %v882_v32  ;;  %v904_v38 = vrot.slane %v903_v36, 4  ;;  %s2286_s10 = sshll.u32 %s578_s9, 4  ;;  %s2293_s14 = sshll.u32 %s584_s11, 4  ;;  %s953_s10 = int_to_ptr.vmem [resolvable:$true] %s2286_s10  ;;  %s968_s14 = int_to_ptr.vmem [resolvable:$true] %s2293_s14 }
 0x159   : > { %s917_s27 = scalar_lea.sflag [#allocation13], %s503_s5 }
 0x15a   : > { %v885_v39 = vrot.slane %v884_v37, 2  ;;  %v905_v40 = vadd.f32 %v904_v38, %v903_v36 }
 0x15b   : > { %s2476_s1 = smov %s2475_s25  ;;  %s950_s17 = scalar_lea.hbm %s2475_s25, %s949_s4 }
 0x15c   : > { %v886_v41 = vadd.f32 %v885_v39, %v884_v37  ;;  %s965_s3 = scalar_lea.hbm %s2477_s13, %s949_s4  ;;  %v906_v42 = vrot.slane %v905_v40, 2  ;;  %s2288_s7 = sshll.u32 %s950_s17, 4  ;;  %s955_s7 = int_to_ptr.hbm [resolvable:$true] %s2288_s7 }
 0x15d   : > { %s2290_s2 = sshll.u32 %s965_s3, 4  ;;  %s1647_s8 = sshra.s32 %s955_s7, 4  ;;  %s970_s2 = int_to_ptr.hbm [resolvable:$true] %s2290_s2  ;;  %s1648_s8 = int_to_ptr.hbm [resolvable:$true] %s1647_s8 }
 0x15e   : > { %v887_v43 = vrot.slane %v886_v41, 1  ;;  %v907_v44 = vadd.f32 %v906_v42, %v905_v40  ;;  %s1649_s4 = scalar_lea.hbm %s1648_s8, 1  ;;  %s1653_s16 = scalar_lea.hbm %s2476_s1, 8 }
 0x15f   : > { %p1650_p10 = scmp.ne.s32.totalorder %s1648_s8, %s1649_s4  ;;  %p1654_p1 = scmp.lt.s32.totalorder %s1648_s8, %s2476_s1 }
 0x160   : > { %v888_v45 = vadd.f32 %v887_v43, %v886_v41  ;;  %v908_v46 = vrot.slane %v907_v44, 1  ;;  %p1655_p3 = scmp.lt.s32.totalorder %s1653_s16, %s1649_s4 }
 0x161   : > { %p1651_p7 = pnand %p1650_p10, %p2088_p11 }
 0x162   : > { %889 = vst [vmem:[%s578_s9] sm:$0x1] %v888_v45  ;;  %v909_v47 = vadd.f32 %v908_v46, %v907_v44  ;;  %p1656_p2 = por %p1655_p3, %p1654_p1 }
 0x163   : > { %p1652_p6 = pneg %p1651_p7 }
 0x165   : > { %p1657_p8 = pnand %p1656_p2, %p1652_p6 }
 0x167   : > { %1660 = shalt.err (!%p1657_p8)
}
 0x168   : > { %1279 = dma.vmem_to_hbm [thread:$0]  (%p2088_p11), %s953_s10, 16, %s955_s7, %s917_s27   ;;  %910 = vst [vmem:[%s584_s11] sm:$0x1] %v909_v47 }
 0x169   : > { %s1675_s12 = sshra.s32 %s970_s2, 4  ;;  %s1681_s3 = scalar_lea.hbm %s2477_s13, 8  ;;  %s1676_s12 = int_to_ptr.hbm [resolvable:$true] %s1675_s12 }
 0x16a   : > { %s1677_s5 = scalar_lea.hbm %s1676_s12, 1  ;;  %p1682_p0 = scmp.lt.s32.totalorder %s1676_s12, %s2477_s13 }
 0x16b   : > { %p1678_p5 = scmp.ne.s32.totalorder %s1676_s12, %s1677_s5  ;;  %p1683_p4 = scmp.lt.s32.totalorder %s1681_s3, %s1677_s5 }
 0x16d   : > { %p1679_p12 = pnand %p1678_p5, %p2088_p11  ;;  %p1684_p10 = por %p1683_p4, %p1682_p0 }
 0x16f   : > { %p1680_p13 = pneg %p1679_p12 }
 0x171   : > { %p1685_p7 = pnand %p1684_p10, %p1680_p13 }
 0x173   : > { %1688 = shalt.err (!%p1685_p7)
}
 0x174   : > { %1280 = dma.vmem_to_hbm [thread:$0]  (%p2088_p11), %s968_s14, 16, %s970_s2, %s917_s27  }
 0x175 PF: > { %p1316_p6 = scmp.ge.s32.totalorder %s1823_s30, 2  ;;  %s981_s10 = sand.u32 1, %s1795_s23  }
 0x176   : > { %s982_s7 = scalar_lea.sflag [#allocation4], %s981_s10 }
 0x177   : > { %p1302_p1 = pnand %p1316_p6, %p2092_p9 }
 0x179   : > { %p1303_p3 = pneg %p1302_p1 }
 0x17b   : > { %1762 = dma.done.wait (%p1303_p3), %s982_s7, 256  }
 0x17c   : > { %1764 = vsyncadd (%p1303_p3), %s982_s7, 4294967040  ;;  %s2478_s11 = sadd.s32 4294967294, %s1823_s30  }
 0x17d   : > { %s991_s28 = sand.u32 1, %s2478_s11  }
 0x17e   : > { %s992_s4 = scalar_lea.sflag [#allocation13], %s991_s28 }
 0x17f   : > { %1766 = dma.done.wait (%p1303_p3), %s992_s4, 32  }
 0x180   : > { %1768 = vsyncadd (%p1303_p3), %s992_s4, 4294967264  ;;  %s35_s30 = sadd.s32 1, %s1823_s30   ;;  %s2480_s20 = sld [smem:[#allocation22_spill]] }
 0x181   : > { %p2334_p11 = scmp.ge.s32.totalorder %s35_s30, 10   ;;  %s2481_s23 = sld [smem:[#allocation33_spill]] }
 0x182   : > { %s2482_s15 = sld [smem:[#allocation23_spill]]  ;;  %s2488_s17 = smov %s1775_s18 }
 0x183   : > { %s2483_s25 = sld [smem:[#allocation34_spill]]  ;;  %s2489_s18 = smov %s1779_s19 }
 0x184   : > { %s2484_s26 = sld [smem:[#allocation26_spill]]  ;;  %s2490_s19 = smov %s2135_s21 }
 0x185   : > { %s2485_s27 = sld [smem:[#allocation27_spill]]  ;;  %s2491_s21 = smov %s1791_s22 }
 0x186   : > { %s2486_s28 = sld [smem:[#allocation29_spill]]  ;;  %34 = sbr.rel (!%p2334_p11) target bundleno = 28 (0x1c), region = 165 }
 0x187   : > { %s2487_s29 = sld [smem:[#allocation30_spill]]  ;;  %s2492_s22 = smov %s2481_s23 }
 0x188   : > { %s2493_s23 = smov %s1799_s24  ;;  %s2494_s24 = smov %s2482_s15 }
 0x18b   :  { %1006 = vsyncpa [#allocation3], 1 }
 0x18c   :  { %1008 = vsyncpa [#allocation3 + $0x1], 1 }
 0x18d   :  { %1009 = vsyncpa [#allocation6], 1 }
 0x18e   :  { %1011 = vsyncpa [#allocation6 + $0x1], 1 }
 0x18f   :  { %1012 = vsyncpa [#allocation9], 1 }
 0x190   :  { %1013 = vsyncpa [#allocation4], 1 }
 0x191   :  { %1015 = vsyncpa [#allocation4 + $0x1], 1 }
 0x192   :  { %1016 = vsyncpa [#allocation13], 1 }
 0x193   :  { %1018 = vsyncpa [#allocation13 + $0x1], 1 }

</bundles_post_ra>
